<compile_context>
chip_gen: v7x
topology: tpu7x:2x2x1
jax: 0.10.0
libtpu: 0.0.40
codegen_flags: <defaults>
</compile_context>

<pallas_src>
import functools

import jax
import jax.numpy as jnp
from jax.experimental import pallas as pl
from jax.experimental.pallas import tpu as pltpu


def _round_up(x, m):
    return ((x + m - 1) // m) * m


# Per-grid-step weight slab budget (bytes).  <= 8 MiB double-buffered.
_WEIGHT_TILE_BUDGET_BYTES = 4 * 1024 * 1024


# ----------------------------------------------------------------------------
# Kernel: K-tiled GEMM accumulating directly into the resident f32 output
# block; dequant-scale + bias applied in the k==last epilogue.
# Grid = (N_tiles, K_tiles); reduction axis (K) innermost / 'arbitrary'.
# ----------------------------------------------------------------------------
def _linear_kernel(x_ref, w_ref, scale_ref, b_ref, o_ref):
    # x_ref:     (Kt, Bp, tk) bf16  activations, fully VMEM-resident
    # w_ref:     (tk, tn)     bf16/int8 block-major pre-folded weight slab
    # scale_ref: (1,  tn)     f32   per-output-column dequant scale (ones for bf16)
    # b_ref:     (1,  tn)     f32   pre-folded bias tile
    # o_ref:     (Bp, tn)     f32   logits tile, resident across K (acts as accumulator)
    k = pl.program_id(1)

    @pl.when(k == 0)
    def _():
        o_ref[...] = jnp.zeros_like(o_ref)

    xk = x_ref[k]                                     # (Bp, tk) bf16, leading-axis index
    o_ref[...] += jnp.dot(
        xk,
        w_ref[...].astype(xk.dtype),                  # int8 -> bf16 is exact; bf16 no-op
        preferred_element_type=jnp.float32,           # f32 accumulation on the MXU
    )

    @pl.when(k == pl.num_programs(1) - 1)
    def _():
        o_ref[...] = o_ref[...] * scale_ref[...] + b_ref[...]


# ----------------------------------------------------------------------------
# One-time parameter preparation (NOT in the hot path).
# Folds normalization into weight/bias, picks byte-budgeted tiles, pads,
# optionally int8-quantizes, and repacks the weight block-major so each
# grid-step weight DMA is a single contiguous HBM slab.
# ----------------------------------------------------------------------------
def prepare_params(weight, bias, mean_c, std_c, data_shape, *,
                   normalize=True, weight_dtype=jnp.bfloat16):
    C, H, W = data_shape
    T, F = weight.shape
    assert F == C * H * W

    if normalize:
        inv_std_c = 1.0 / jnp.maximum(std_c.astype(jnp.float32), 1e-12)
        inv_std_f = jnp.broadcast_to(inv_std_c[:, None, None], (C, H, W)).reshape(F)
        mean_f = jnp.broadcast_to(mean_c.astype(jnp.float32)[:, None, None],
                                  (C, H, W)).reshape(F)
    else:
        inv_std_f = jnp.ones((F,), jnp.float32)
        mean_f = jnp.zeros((F,), jnp.float32)

    # (x - mean) * inv_std @ W^T + b  ==  x @ W'^T + b'
    w_fold = (weight.astype(jnp.float32) * inv_std_f[None, :]).T          # (F, T) f32
    b_fold = bias.astype(jnp.float32) - jnp.dot(
        weight.astype(jnp.float32), mean_f * inv_std_f,
        precision=jax.lax.Precision.HIGHEST)                              # (T,)

    # ---- byte-budgeted tile selection ----
    Tp = max(128, _round_up(T, 128))
    tn = next(t for t in (512, 256, 128) if Tp % t == 0)                  # lane-dense
    itemsize = jnp.dtype(weight_dtype).itemsize
    tk_budget = max(128, (_WEIGHT_TILE_BUDGET_BYTES // (tn * itemsize)) // 128 * 128)
    tk = min(tk_budget, _round_up(F, 128))                                # mult of 128
    Fp = _round_up(F, tk)

    # Pad folded weight / bias.
    w_pad = jnp.zeros((Fp, Tp), jnp.float32).at[:F, :T].set(w_fold)
    b_pad = jnp.zeros((1, Tp), jnp.float32).at[0, :T].set(b_fold)

    if jnp.dtype(weight_dtype) == jnp.dtype(jnp.int8):
        col_amax = jnp.max(jnp.abs(w_pad), axis=0)                        # (Tp,)
        scale = jnp.where(col_amax > 0, col_amax / 127.0, 1.0)
        w_store = jnp.clip(jnp.round(w_pad / scale[None, :]), -127, 127).astype(jnp.int8)
    else:
        scale = jnp.ones((Tp,), jnp.float32)
        w_store = w_pad.astype(weight_dtype)

    # Block-major repack: (Tp//tn, Fp, tn) -> each (tk, tn) grid-step slab is
    # one contiguous HBM burst.
    w_blocked = w_store.reshape(Fp, Tp // tn, tn).transpose(1, 0, 2)
    scale_pad = scale.reshape(1, Tp)

    return {"w": w_blocked, "scale": scale_pad, "b": b_pad,
            "n_out": T, "F": F, "tk": tk, "tn": tn}


# ----------------------------------------------------------------------------
# Hot-path forward.
# ----------------------------------------------------------------------------
@functools.partial(jax.jit, static_argnames=("n_out", "F", "tk", "tn"))
def linear_forward(x_nchw, w_blocked, scale_pad, b_pad, *, n_out, F, tk, tn):
    B = x_nchw.shape[0]
    n_blk, Fp, _ = w_blocked.shape
    Tp = n_blk * tn
    Kt = Fp // tk

    # Cast activations to bf16 once; pad batch to 16 (bf16 sublane packing)
    # and features to Fp; lay out K-chunk-major so the kernel only indexes
    # the leading axis.
    Bp = max(16, _round_up(B, 16))
    x = x_nchw.reshape(B, -1).astype(jnp.bfloat16)
    x = jnp.pad(x, ((0, Bp - B), (0, Fp - F)))
    x = x.reshape(Bp, Kt, tk).transpose(1, 0, 2)                          # (Kt, Bp, tk)

    # Explicit scoped-VMEM limit from the real footprint (v7x: 64 MiB physical).
    w_tile_bytes = tk * tn * w_blocked.dtype.itemsize
    est = (2 * w_tile_bytes                       # double-buffered weight slab
           + 2 * Kt * Bp * tk * 2                 # resident bf16 activations
           + 2 * Bp * tn * 4                      # output tile
           + 4 * tn * 4 * 2                       # scale + bias tiles
           + (2 << 20))                           # slack
    vmem_limit = int(min(max(est, 32 << 20), 48 << 20))

    out_pad = pl.pallas_call(
        _linear_kernel,
        out_shape=jax.ShapeDtypeStruct((Bp, Tp), jnp.float32),
        grid_spec=pltpu.PrefetchScalarGridSpec(
            num_scalar_prefetch=0,
            grid=(Tp // tn, Kt),                                   # (N tiles, K tiles)
            in_specs=[
                pl.BlockSpec((Kt, Bp, tk), lambda j, k: (0, 0, 0)),    # x: resident
                pl.BlockSpec((None, tk, tn), lambda j, k: (j, k, 0)),  # weight slab
                pl.BlockSpec((1, tn), lambda j, k: (0, j)),            # dequant scale
                pl.BlockSpec((1, tn), lambda j, k: (0, j)),            # bias tile
            ],
            out_specs=pl.BlockSpec((Bp, tn), lambda j, k: (0, j)),
        ),
        compiler_params=pltpu.CompilerParams(
            # N tiles independent -> 'parallel'; K is a reduction onto the
            # resident output block -> 'arbitrary' (innermost).
            dimension_semantics=("parallel", "arbitrary"),
            vmem_limit_bytes=vmem_limit,
        ),
    )(x, w_blocked, scale_pad, b_pad)

    return out_pad[:B, :n_out]


def module_forward(input_dict, prepared):
    """Mirror of Linear.forward: returns {'target': logits, ...}."""
    x = input_dict["data"]
    do_norm = bool(input_dict.get("norm", True))
    p = prepared["norm"] if do_norm else prepared["raw"]
    logits = linear_forward(x, p["w"], p["scale"], p["b"],
                            n_out=p["n_out"], F=p["F"], tk=p["tk"], tn=p["tn"])
    output = {"target": logits}
    # TODO(synk): loss_fn / cfg['sneak'] are defined outside the module; loss not implemented here.
    return output


def _same_precision_ref(x, p, B, F):
    """Reference mirroring the kernel's exact dtype path (bf16 MXU dot, f32 acc)."""
    n_blk, Fp, tn = p["w"].shape
    Tp = n_blk * tn
    w2d = p["w"].transpose(1, 0, 2).reshape(Fp, Tp)                       # stored dtype
    xb = x.reshape(B, F).astype(jnp.bfloat16)
    acc = jnp.dot(xb, w2d[:F, :].astype(jnp.bfloat16),
                  preferred_element_type=jnp.float32)
    out = acc * p["scale"][0][None, :] + p["b"][0][None, :]
    return out[:, :p["n_out"]]


if __name__ == "__main__":
    key = jax.random.PRNGKey(0)

    # Shapes implied by the module: data_shape = (C, H, W), target_size = T.
    B, C, H, W = 2, 4, 16, 16
    T = 10
    F = C * H * W

    k_x, k_w, k_b = jax.random.split(key, 3)
    x = jax.random.normal(k_x, (B, C, H, W), dtype=jnp.float32)

    # Deterministic nn.Linear-style init: U(-1/sqrt(F), 1/sqrt(F)).
    bound = 1.0 / (F ** 0.5)
    weight = jax.random.uniform(k_w, (T, F), jnp.float32, -bound, bound)
    bias = jax.random.uniform(k_b, (T,), jnp.float32, -bound, bound)

    # Synthetic cfg['stats'][cfg['data_name']] per-channel normalization stats.
    mean_c = jnp.full((C,), 0.5, jnp.float32)
    std_c = jnp.full((C,), 0.25, jnp.float32)

    prepared = {
        "norm": prepare_params(weight, bias, mean_c, std_c, (C, H, W), normalize=True),
        "raw":  prepare_params(weight, bias, mean_c, std_c, (C, H, W), normalize=False),
    }

    # --- norm=True path (module default) ---
    out = module_forward({"data": x, "norm": True}, prepared)
    logits = jax.block_until_ready(out["target"])
    assert logits.shape == (B, T)

    x_n = (x - mean_c[None, :, None, None]) / std_c[None, :, None, None]
    ref_f32 = x_n.reshape(B, -1) @ weight.T + bias[None, :]
    assert jnp.allclose(logits, ref_f32, atol=5e-2, rtol=5e-2)
    assert jnp.allclose(logits, _same_precision_ref(x, prepared["norm"], B, F),
                        atol=1e-2, rtol=1e-2)

    # --- norm=False path (module's optional flag) ---
    out_raw = module_forward({"data": x, "norm": False}, prepared)
    logits_raw = jax.block_until_ready(out_raw["target"])
    ref_raw = x.reshape(B, -1) @ weight.T + bias[None, :]
    assert jnp.allclose(logits_raw, ref_raw, atol=5e-2, rtol=5e-2)

    # --- int8-quantized weight path (halves the dominant weight HBM stream) ---
    p_q = prepare_params(weight, bias, mean_c, std_c, (C, H, W),
                         normalize=True, weight_dtype=jnp.int8)
    logits_q = jax.block_until_ready(
        linear_forward(x, p_q["w"], p_q["scale"], p_q["b"],
                       n_out=p_q["n_out"], F=p_q["F"], tk=p_q["tk"], tn=p_q["tn"]))
    assert jnp.allclose(logits_q, _same_precision_ref(x, p_q, B, F), atol=1e-2, rtol=1e-2)
    assert jnp.allclose(logits_q, ref_f32, atol=2e-1, rtol=1e-1)

    print("KERNEL_OK")
</pallas_src>

<mosaic_0001>
module attributes {stable_mosaic.version = 11 : i64} {
  func.func @_linear_kernel(%arg0: i32, %arg1: i32, %arg2: memref<1x16x1024xbf16, #tpu.memory_space<vmem>>, %arg3: memref<1x1024x128xbf16, #tpu.memory_space<vmem>>, %arg4: memref<1x128xf32, #tpu.memory_space<vmem>>, %arg5: memref<1x128xf32, #tpu.memory_space<vmem>>, %arg6: memref<16x128xf32, #tpu.memory_space<vmem>>) attributes {dimension_semantics = [#tpu.dimension_semantics<parallel>, #tpu.dimension_semantics<arbitrary>], iteration_bounds = array<i64: 1, 1>, scalar_prefetch = 0 : i64, scratch_operands = 0 : i64, tpu.core_type = #tpu.core_type<tc>, window_params = [{pipeline_mode = #tpu.pipeline_mode<synchronous>, transform_indices = @transform_0, window_bounds = array<i64: 1, 16, 1024>}, {transform_indices = @transform_1, window_bounds = array<i64: 1, 1024, 128>}, {transform_indices = @transform_2, window_bounds = array<i64: 1, 128>}, {transform_indices = @transform_3, window_bounds = array<i64: 1, 128>}, {transform_indices = @transform_4, window_bounds = array<i64: 16, 128>}]} {
    %c0_i32 = arith.constant 0 : i32
    %0 = arith.cmpi eq, %arg1, %c0_i32 : i32
    %1 = arith.extui %0 : i1 to i32
    %c0_i32_0 = arith.constant 0 : i32
    %2 = arith.cmpi ne, %1, %c0_i32_0 : i32
    scf.if %2 {
      %cst_11 = arith.constant 0.000000e+00 : f32
      %15 = vector.broadcast %cst_11 : f32 to vector<16x128xf32>
      %c0_12 = arith.constant 0 : index
      %c0_13 = arith.constant 0 : index
      %16 = vector.load %arg6[%c0_12, %c0_13] : memref<16x128xf32, #tpu.memory_space<vmem>>, vector<16x128xf32>
      tpu.vector_store %arg6[%c0_12, %c0_13], %15 {strides = array<i32>} : memref<16x128xf32, #tpu.memory_space<vmem>>, vector<16x128xf32>,
    } else {
    }
    %3 = arith.index_cast %arg1 : i32 to index
    %c0 = arith.constant 0 : index
    %c0_1 = arith.constant 0 : index
    %4 = vector.load %arg2[%3, %c0, %c0_1] : memref<1x16x1024xbf16, #tpu.memory_space<vmem>>, vector<1x16x1024xbf16>
    %5 = vector.shape_cast %4 : vector<1x16x1024xbf16> to vector<16x1024xbf16>
    %c0_2 = arith.constant 0 : index
    %c0_3 = arith.constant 0 : index
    %6 = vector.load %arg6[%c0_2, %c0_3] : memref<16x128xf32, #tpu.memory_space<vmem>>, vector<16x128xf32>
    %c0_4 = arith.constant 0 : index
    %c0_5 = arith.constant 0 : index
    %c0_6 = arith.constant 0 : index
    %7 = vector.load %arg3[%c0_4, %c0_5, %c0_6] : memref<1x1024x128xbf16, #tpu.memory_space<vmem>>, vector<1x1024x128xbf16>
    %8 = vector.shape_cast %7 : vector<1x1024x128xbf16> to vector<1024x128xbf16>
    %cst = arith.constant dense<0.000000e+00> : vector<16x128xf32>
    %9 = tpu.matmul %5, %8, %cst {dimension_numbers = #tpu.dot_dimension_numbers<[1], [0], [0], [1], [0, 0, 1, 1], [], []>} : vector<16x1024xbf16>, vector<1024x128xbf16>, vector<16x128xf32> -> vector<16x128xf32>
    %10 = arith.addf %6, %9 : vector<16x128xf32>
    %c0_7 = arith.constant 0 : index
    %c0_8 = arith.constant 0 : index
    %11 = vector.load %arg6[%c0_7, %c0_8] : memref<16x128xf32, #tpu.memory_space<vmem>>, vector<16x128xf32>
    tpu.vector_store %arg6[%c0_7, %c0_8], %10 {strides = array<i32>} : memref<16x128xf32, #tpu.memory_space<vmem>>, vector<16x128xf32>,
    %c0_i32_9 = arith.constant 0 : i32
    %12 = arith.cmpi eq, %arg1, %c0_i32_9 : i32
    %13 = arith.extui %12 : i1 to i32
    %c0_i32_10 = arith.constant 0 : i32
    %14 = arith.cmpi ne, %13, %c0_i32_10 : i32
    scf.if %14 {
      %c0_11 = arith.constant 0 : index
      %c0_12 = arith.constant 0 : index
      %15 = vector.load %arg6[%c0_11, %c0_12] : memref<16x128xf32, #tpu.memory_space<vmem>>, vector<16x128xf32>
      %c0_13 = arith.constant 0 : index
      %c0_14 = arith.constant 0 : index
      %16 = vector.load %arg4[%c0_13, %c0_14] : memref<1x128xf32, #tpu.memory_space<vmem>>, vector<1x128xf32>
      %17 = vector.broadcast %16 : vector<1x128xf32> to vector<16x128xf32>
      %18 = arith.mulf %15, %17 : vector<16x128xf32>
      %c0_15 = arith.constant 0 : index
      %c0_16 = arith.constant 0 : index
      %19 = vector.load %arg5[%c0_15, %c0_16] : memref<1x128xf32, #tpu.memory_space<vmem>>, vector<1x128xf32>
      %20 = vector.broadcast %19 : vector<1x128xf32> to vector<16x128xf32>
      %21 = arith.addf %18, %20 : vector<16x128xf32>
      %c0_17 = arith.constant 0 : index
      %c0_18 = arith.constant 0 : index
      %22 = vector.load %arg6[%c0_17, %c0_18] : memref<16x128xf32, #tpu.memory_space<vmem>>, vector<16x128xf32>
      tpu.vector_store %arg6[%c0_17, %c0_18], %21 {strides = array<i32>} : memref<16x128xf32, #tpu.memory_space<vmem>>, vector<16x128xf32>,
    } else {
    }
    return
  }
  func.func @transform_0(%arg0: i32, %arg1: i32) -> (i32, i32, i32) {
    %c0_i32 = arith.constant 0 : i32
    %c0_i32_0 = arith.constant 0 : i32
    %c0_i32_1 = arith.constant 0 : i32
    %c0_i32_2 = arith.constant 0 : i32
    return %c0_i32, %c0_i32_0, %c0_i32_1 : i32, i32, i32
  }
  func.func @transform_1(%arg0: i32, %arg1: i32) -> (i32, i32, i32) {
    %c0_i32 = arith.constant 0 : i32
    %c0_i32_0 = arith.constant 0 : i32
    return %arg0, %arg1, %c0_i32 : i32, i32, i32
  }
  func.func @transform_2(%arg0: i32, %arg1: i32) -> (i32, i32) {
    %c0_i32 = arith.constant 0 : i32
    %c0_i32_0 = arith.constant 0 : i32
    return %c0_i32, %arg0 : i32, i32
  }
  func.func @transform_3(%arg0: i32, %arg1: i32) -> (i32, i32) {
    %c0_i32 = arith.constant 0 : i32
    %c0_i32_0 = arith.constant 0 : i32
    return %c0_i32, %arg0 : i32, i32
  }
  func.func @transform_4(%arg0: i32, %arg1: i32) -> (i32, i32) {
    %c0_i32 = arith.constant 0 : i32
    %c0_i32_0 = arith.constant 0 : i32
    return %c0_i32, %arg0 : i32, i32
  }
}

</mosaic_0001>

<bundles_post_ra>
// kernel: linear_forward.1
= control target key start
LH: loop header
LB: loop body
LE: loop exit
PB: predicated region body
PF: predicated region fallthrough
CT: control target
= control target key end

     0   :  { %9 = vsyncpa [#allocation3], 0  ;;  %s1055_s15 = smov [#allocation2]   ;;  %s1131_s0 = inlined_call_operand.vmem [shape: bf16[1,16,1024], index: 0, kind: input, shape index: {}]   ;;  %s1132_s1 = inlined_call_operand.hbm [shape: bf16[1,1024,128], index: 1, kind: input, shape index: {}]   ;;  %s1133_s2 = inlined_call_operand.vmem [shape: f32[1,128], index: 2, kind: input, shape index: {}]   ;;  %s1134_s3 = inlined_call_operand.vmem [shape: f32[1,128], index: 3, kind: input, shape index: {}]   ;;  %s1135_s4 = inlined_call_operand.vmem [shape: f32[16,128], index: 4, kind: output, shape index: {}]  }
   0x1   :  { %s17_s16 = sshll.u32 %s1055_s15, 4  ;;  %s1031_s19 = scalar_lea.hbm %s1132_s1, 8192  ;;  %s18_s16 = int_to_ptr.vmem [resolvable:$true] %s17_s16 }
   0x2   :  { %p1032_p0 = scmp.ne.s32.totalorder %s1132_s1, %s1031_s19  ;;  %p1035_p1 = scmp.lt.u32.totalorder %s1031_s19, %s1132_s1 }
   0x4   :  { %p1037_p2 = pnand %p1035_p1, %p1032_p0 }
   0x6   :  { %1040 = shalt.err (!%p1037_p2)
}
   0x7   :  { %s1041_s24 = scalar_lea.vmem %s18_s16, 8192  ;;  %p1046_p4 = scmp.lt.s32.totalorder %s18_s16, %s18_s16 }
   0x8   :  { %p1042_p3 = scmp.ne.s32.totalorder %s18_s16, %s1041_s24  ;;  %p1047_p5 = scmp.lt.s32.totalorder %s1041_s24, %s1041_s24 }
   0xa   :  { %p1048_p6 = por %p1047_p5, %p1046_p4 }
   0xc   :  { %p1049_p7 = pnand %p1048_p6, %p1042_p3 }
   0xe   :  { %1052 = shalt.err (!%p1049_p7)
}
   0xf   :  { %s1056_s25 = smov 64   ;;  %s1057_s26 = smov 4  }
  0x10   :  { %23 = dma.hbm_to_vmem [thread:$0]  %s1132_s1, 8192, %s18_s16, [#allocation3], %s1056_s25, %s1056_s25, %s1057_s26  }
  0x11   :  { %1053 = dma.done.wait [#allocation3], 8192  }
  0x12   :  { %1054 = vsyncadd [#allocation3], 4294959104  ;;  %v967_v0 = vld [vmem:[#allocation2 + $0x40] sm:$0xff]   ;;  %v971_v4 = vld [vmem:[#allocation2 + $0x48] sm:$0xff]  }
  0x13   :  { %v968_v1 = vld [vmem:[#allocation2 + $0xc0] sm:$0xff]   ;;  %875 = vmatprep.subr.bf16.mxu0 %v967_v0  ;;  %v972_v5 = vld [vmem:[#allocation2 + $0xc8] sm:$0xff]   ;;  %v975_v8 = vld [vmem:[#allocation2 + $0x50] sm:$0xff]  }
  0x14   :  { %v969_v2 = vld [vmem:[#allocation2] sm:$0xff]   ;;  %897 = vmatprep.subr.bf16.mxu1 %v968_v1  ;;  %v973_v6 = vld [vmem:[#allocation2 + $0x8] sm:$0xff]   ;;  %v976_v9 = vld [vmem:[#allocation2 + $0xd0] sm:$0xff]  }
  0x15   :  { %v970_v3 = vld [vmem:[#allocation2 + $0x80] sm:$0xff]   ;;  %876 = vmatpush3.bf16.msra.mxu0 %v969_v2  ;;  %v974_v7 = vld [vmem:[#allocation2 + $0x88] sm:$0xff]   ;;  %v977_v10 = vld [vmem:[#allocation2 + $0x10] sm:$0xff]  }
  0x16   :  { %898 = vmatpush3.bf16.msra.mxu1 %v970_v3  ;;  %877 = vmatprep.subr.bf16.mxu0 %v971_v4  ;;  %v978_v11 = vld [vmem:[#allocation2 + $0x90] sm:$0xff]   ;;  %v979_v12 = vld [vmem:[#allocation2 + $0x58] sm:$0xff]   ;;  %v983_v16 = vld [vmem:[#allocation2 + $0x60] sm:$0xff]  }
  0x17   :  { %899 = vmatprep.subr.bf16.mxu1 %v972_v5  ;;  %v980_v13 = vld [vmem:[#allocation2 + $0xd8] sm:$0xff]   ;;  %v984_v17 = vld [vmem:[#allocation2 + $0xe0] sm:$0xff]   ;;  %v987_v20 = vld [vmem:[#allocation2 + $0x68] sm:$0xff]  }
  0x18   :  { %v981_v14 = vld [vmem:[#allocation2 + $0x18] sm:$0xff]   ;;  %v985_v18 = vld [vmem:[#allocation2 + $0x20] sm:$0xff]   ;;  %v988_v21 = vld [vmem:[#allocation2 + $0xe8] sm:$0xff]  }
  0x19   :  { %878 = vmatpush3.bf16.msra.mxu0 %v973_v6  ;;  %v982_v15 = vld [vmem:[#allocation2 + $0x98] sm:$0xff]   ;;  %v986_v19 = vld [vmem:[#allocation2 + $0xa0] sm:$0xff]   ;;  %v989_v22 = vld [vmem:[#allocation2 + $0x28] sm:$0xff]  }
  0x1a   :  { %900 = vmatpush3.bf16.msra.mxu1 %v974_v7  ;;  %879 = vmatprep.subr.bf16.mxu0 %v975_v8  ;;  %v990_v23 = vld [vmem:[#allocation2 + $0xa8] sm:$0xff]   ;;  %v991_v24 = vld [vmem:[#allocation2 + $0x70] sm:$0xff]   ;;  %v995_v28 = vld [vmem:[#allocation2 + $0x78] sm:$0xff]  }
  0x1b   :  { %901 = vmatprep.subr.bf16.mxu1 %v976_v9  ;;  %v992_v25 = vld [vmem:[#allocation2 + $0xf0] sm:$0xff]   ;;  %v996_v29 = vld [vmem:[#allocation2 + $0xf8] sm:$0xff]   ;;  %v41_v32 = vld [vmem:[%s1131_s0] sm:$0xff] }
  0x1c   :  { %v993_v26 = vld [vmem:[#allocation2 + $0x30] sm:$0xff]   ;;  %v997_v30 = vld [vmem:[#allocation2 + $0x38] sm:$0xff]   ;;  %v45_v33 = vld [vmem:[%s1131_s0 + $0x20] sm:$0xff] }
  0x1d   :  { %880 = vmatpush3.bf16.msra.mxu0 %v977_v10  ;;  %v994_v27 = vld [vmem:[#allocation2 + $0xb0] sm:$0xff]   ;;  %v998_v31 = vld [vmem:[#allocation2 + $0xb8] sm:$0xff]   ;;  %v42_v34 = vld [vmem:[%s1131_s0 + $0x8] sm:$0xff]  ;;  %v801_v35 = vcombine.low %v41_v32, %v45_v33  ;;  %v802_v36 = vcombine.high %v41_v32, %v45_v33 }
  0x1e   :  { %902 = vmatpush3.bf16.msra.mxu1 %v978_v11  ;;  %881 = vmatprep.subr.bf16.mxu0 %v979_v12  ;;  %v46_v37 = vld [vmem:[%s1131_s0 + $0x28] sm:$0xff]  ;;  %v999_v40 = vld [vmem:[#allocation2 + $0x140] sm:$0xff]   ;;  %v1007_v48 = vld [vmem:[#allocation2 + $0x150] sm:$0xff]  }
  0x1f   :  { %903 = vmatprep.subr.bf16.mxu1 %v980_v13  ;;  %v803_v38 = vcombine.low %v42_v34, %v46_v37  ;;  %v804_v39 = vcombine.high %v42_v34, %v46_v37  ;;  %635 = vmatprep.mubr.bf16.mxu0 %v802_v36  ;;  %v1000_v41 = vld [vmem:[#allocation2 + $0x1c0] sm:$0xff]   ;;  %v1003_v44 = vld [vmem:[#allocation2 + $0x148] sm:$0xff]   ;;  %v1008_v49 = vld [vmem:[#allocation2 + $0x1d0] sm:$0xff]  }
  0x20   :  { %v1001_v42 = vld [vmem:[#allocation2 + $0x100] sm:$0xff]   ;;  %v1004_v45 = vld [vmem:[#allocation2 + $0x1c8] sm:$0xff]   ;;  %v1009_v50 = vld [vmem:[#allocation2 + $0x110] sm:$0xff]  }
  0x21   :  { %882 = vmatpush3.bf16.msra.mxu0 %v981_v14  ;;  %676 = vmatprep.mubr.bf16.mxu1 %v804_v39  ;;  %v1002_v43 = vld [vmem:[#allocation2 + $0x180] sm:$0xff]   ;;  %v1005_v46 = vld [vmem:[#allocation2 + $0x108] sm:$0xff]   ;;  %v1010_v51 = vld [vmem:[#allocation2 + $0x190] sm:$0xff]  }
  0x22   :  { %904 = vmatpush3.bf16.msra.mxu1 %v982_v15  ;;  %883 = vmatprep.subr.bf16.mxu0 %v983_v16  ;;  %v1006_v47 = vld [vmem:[#allocation2 + $0x188] sm:$0xff]   ;;  %v1011_v52 = vld [vmem:[#allocation2 + $0x158] sm:$0xff]   ;;  %v1015_v56 = vld [vmem:[#allocation2 + $0x160] sm:$0xff]  }
  0x23   :  { %905 = vmatprep.subr.bf16.mxu1 %v984_v17  ;;  %v1012_v53 = vld [vmem:[#allocation2 + $0x1d8] sm:$0xff]   ;;  %v1016_v57 = vld [vmem:[#allocation2 + $0x1e0] sm:$0xff]   ;;  %v1019_v60 = vld [vmem:[#allocation2 + $0x168] sm:$0xff]  }
  0x24   :  { %v1013_v54 = vld [vmem:[#allocation2 + $0x118] sm:$0xff]   ;;  %v1017_v58 = vld [vmem:[#allocation2 + $0x120] sm:$0xff]   ;;  %v1020_v61 = vld [vmem:[#allocation2 + $0x1e8] sm:$0xff]  }
  0x25   :  { %884 = vmatpush3.bf16.msra.mxu0 %v985_v18  ;;  %v1014_v55 = vld [vmem:[#allocation2 + $0x198] sm:$0xff]   ;;  %v1018_v59 = vld [vmem:[#allocation2 + $0x1a0] sm:$0xff]   ;;  %v1021_v62 = vld [vmem:[#allocation2 + $0x128] sm:$0xff]  }
  0x26   :  { %906 = vmatpush3.bf16.msra.mxu1 %v986_v19  ;;  %885 = vmatprep.subr.bf16.mxu0 %v987_v20  ;;  %v1022_v63 = vld [vmem:[#allocation2 + $0x1a8] sm:$0xff]   ;;  %v1023_v0 = vld [vmem:[#allocation2 + $0x170] sm:$0xff]   ;;  %v1027_v4 = vld [vmem:[#allocation2 + $0x178] sm:$0xff]  }
  0x27   :  { %907 = vmatprep.subr.bf16.mxu1 %v988_v21  ;;  %v1024_v1 = vld [vmem:[#allocation2 + $0x1f0] sm:$0xff]   ;;  %v1028_v5 = vld [vmem:[#allocation2 + $0x1f8] sm:$0xff]  }
  0x28   :  { %v1025_v2 = vld [vmem:[#allocation2 + $0x130] sm:$0xff]   ;;  %v1029_v6 = vld [vmem:[#allocation2 + $0x138] sm:$0xff]  }
  0x29   :  { %886 = vmatpush3.bf16.msra.mxu0 %v989_v22  ;;  %v1026_v3 = vld [vmem:[#allocation2 + $0x1b0] sm:$0xff]   ;;  %v1030_v7 = vld [vmem:[#allocation2 + $0x1b8] sm:$0xff]  }
  0x2a   :  { %908 = vmatpush3.bf16.msra.mxu1 %v990_v23  ;;  %887 = vmatprep.subr.bf16.mxu0 %v991_v24  ;;  %v43_v8 = vld [vmem:[%s1131_s0 + $0x10] sm:$0xff]  ;;  %v44_v12 = vld [vmem:[%s1131_s0 + $0x18] sm:$0xff] }
  0x2b   :  { %909 = vmatprep.subr.bf16.mxu1 %v992_v25  ;;  %v47_v9 = vld [vmem:[%s1131_s0 + $0x30] sm:$0xff]  ;;  %v48_v13 = vld [vmem:[%s1131_s0 + $0x38] sm:$0xff] }
  0x2c   :  { %v805_v10 = vcombine.low %v43_v8, %v47_v9  ;;  %v806_v11 = vcombine.high %v43_v8, %v47_v9  ;;  %v807_v14 = vcombine.low %v44_v12, %v48_v13  ;;  %v808_v15 = vcombine.high %v44_v12, %v48_v13 }
  0x2d   :  { %888 = vmatpush3.bf16.msra.mxu0 %v993_v26 }
  0x2e   :  { %910 = vmatpush3.bf16.msra.mxu1 %v994_v27  ;;  %889 = vmatprep.subr.bf16.mxu0 %v995_v28 }
  0x2f   :  { %911 = vmatprep.subr.bf16.mxu1 %v996_v29 }
  0x31   :  { %890 = vmatpush3.bf16.msra.mxu0 %v997_v30 }
  0x32   :  { %912 = vmatpush3.bf16.msra.mxu1 %v998_v31  ;;  %919 = vmatprep.subr.bf16.mxu0 %v999_v40 }
  0x33   :  { %941 = vmatprep.subr.bf16.mxu1 %v1000_v41 }
  0x34   :  { %636 = vmatmul.mubr.bf16.vlgmr.msra.gmra.mrb[0].mxu0 %v801_v35 }
  0x35   :  { %677 = vmatmul.mubr.bf16.vlgmr.msra.gmra.mrb[0].mxu1 %v803_v38  ;;  %920 = vmatpush3.bf16.msra.mxu0 %v1001_v42 }
  0x36   :  { %942 = vmatpush3.bf16.msra.mxu1 %v1002_v43  ;;  %921 = vmatprep.subr.bf16.mxu0 %v1003_v44 }
  0x37   :  { %943 = vmatprep.subr.bf16.mxu1 %v1004_v45  ;;  %717 = vmatprep.mubr.bf16.mxu0 %v806_v11  ;;  %v873_v45 = vld [vmem:[%s1133_s2] ss:$0 sm:$0xff] }
  0x38   :  { %758 = vmatprep.mubr.bf16.mxu1 %v808_v15 }
  0x39   :  { %922 = vmatpush3.bf16.msra.mxu0 %v1005_v46 }
  0x3a   :  { %944 = vmatpush3.bf16.msra.mxu1 %v1006_v47  ;;  %923 = vmatprep.subr.bf16.mxu0 %v1007_v48  ;;  %v874_v47 = vld [vmem:[%s1134_s3] ss:$0 sm:$0xff] }
  0x3b   :  { %945 = vmatprep.subr.bf16.mxu1 %v1008_v49 }
  0x3d   :  { %924 = vmatpush3.bf16.msra.mxu0 %v1009_v50 }
  0x3e   :  { %946 = vmatpush3.bf16.msra.mxu1 %v1010_v51  ;;  %925 = vmatprep.subr.bf16.mxu0 %v1011_v52 }
  0x3f   :  { %947 = vmatprep.subr.bf16.mxu1 %v1012_v53 }
  0x41   :  { %926 = vmatpush3.bf16.msra.mxu0 %v1013_v54 }
  0x42   :  { %948 = vmatpush3.bf16.msra.mxu1 %v1014_v55  ;;  %927 = vmatprep.subr.bf16.mxu0 %v1015_v56 }
  0x43   :  { %949 = vmatprep.subr.bf16.mxu1 %v1016_v57 }
  0x45   :  { %928 = vmatpush3.bf16.msra.mxu0 %v1017_v58 }
  0x46   :  { %950 = vmatpush3.bf16.msra.mxu1 %v1018_v59  ;;  %929 = vmatprep.subr.bf16.mxu0 %v1019_v60 }
  0x47   :  { %951 = vmatprep.subr.bf16.mxu1 %v1020_v61 }
  0x49   :  { %930 = vmatpush3.bf16.msra.mxu0 %v1021_v62 }
  0x4a   :  { %952 = vmatpush3.bf16.msra.mxu1 %v1022_v63  ;;  %931 = vmatprep.subr.bf16.mxu0 %v1023_v0 }
  0x4b   :  { %953 = vmatprep.subr.bf16.mxu1 %v1024_v1 }
  0x4d   :  { %932 = vmatpush3.bf16.msra.mxu0 %v1025_v2 }
  0x4e   :  { %954 = vmatpush3.bf16.msra.mxu1 %v1026_v3  ;;  %933 = vmatprep.subr.bf16.mxu0 %v1027_v4 }
  0x4f   :  { %955 = vmatprep.subr.bf16.mxu1 %v1028_v5 }
  0x51   :  { %934 = vmatpush3.bf16.msra.mxu0 %v1029_v6 }
  0x52   :  { %956 = vmatpush3.bf16.msra.mxu1 %v1030_v7 }
  0x54   :  { %718 = vmatmul.mubr.bf16.vlgmr.msra.gmra.mrb[4].mxu0 %v805_v10 }
  0x55   :  { %759 = vmatmul.mubr.bf16.vlgmr.msra.gmra.mrb[4].mxu1 %v807_v14 }
 0x107   :  { %v891_v16 = vpop.f32.mrb[0].mxu0 }
 0x108   :  { %v913_v17 = vpop.f32.mrb[0].mxu1  ;;  %v892_v18 = vpop.f32.mrb[1].mxu0 }
 0x109   :  { %v893_v19 = vadd.f32 %v892_v18, %v891_v16  ;;  %v914_v20 = vpop.f32.mrb[1].mxu1  ;;  %v894_v21 = vpop.f32.mrb[2].mxu0 }
 0x10a   :  { %v915_v22 = vadd.f32 %v914_v20, %v913_v17  ;;  %v916_v23 = vpop.f32.mrb[2].mxu1  ;;  %v895_v24 = vpop.f32.mrb[3].mxu0 }
 0x10b   :  { %v896_v25 = vadd.f32 %v895_v24, %v894_v21  ;;  %v917_v26 = vpop.f32.mrb[3].mxu1 }
 0x10c   :  { %v679_v27 = vadd.f32 %v915_v22, %v893_v19  ;;  %v918_v28 = vadd.f32 %v917_v26, %v916_v23 }
 0x10e   :  { %v682_v29 = vadd.f32 %v918_v28, %v896_v25 }
 0x127   :  { %v935_v30 = vpop.f32.mrb[4].mxu0 }
 0x128   :  { %v957_v31 = vpop.f32.mrb[4].mxu1  ;;  %v936_v32 = vpop.f32.mrb[5].mxu0 }
 0x129   :  { %v937_v33 = vadd.f32 %v936_v32, %v935_v30  ;;  %v958_v34 = vpop.f32.mrb[5].mxu1  ;;  %v938_v35 = vpop.f32.mrb[6].mxu0 }
 0x12a   :  { %v959_v36 = vadd.f32 %v958_v34, %v957_v31  ;;  %v960_v37 = vpop.f32.mrb[6].mxu1  ;;  %v939_v38 = vpop.f32.mrb[7].mxu0 }
 0x12b   :  { %v720_v39 = vadd.f32 %v937_v33, %v679_v27  ;;  %v940_v40 = vadd.f32 %v939_v38, %v938_v35  ;;  %v961_v41 = vpop.f32.mrb[7].mxu1 }
 0x12c   :  { %v962_v42 = vadd.f32 %v961_v41, %v960_v37 }
 0x12d   :  { %v761_v43 = vadd.f32 %v959_v36, %v720_v39  ;;  %v723_v44 = vadd.f32 %v940_v40, %v682_v29 }
 0x12f   :  { %v764_v46 = vadd.f32 %v962_v42, %v723_v44  ;;  %v783_v48 = vmul.f32 %v873_v45, %v761_v43 }
 0x131   :  { %v792_v49 = vadd.f32 %v874_v47, %v783_v48  ;;  %v784_v50 = vmul.f32 %v873_v45, %v764_v46 }
 0x133   :  { %794 = vst [vmem:[%s1135_s4] sm:$0xff] %v792_v49  ;;  %v793_v51 = vadd.f32 %v874_v47, %v784_v50 }
 0x135   :  { %795 = vst [vmem:[%s1135_s4 + $0x8] sm:$0xff] %v793_v51 }
 0x136   :  { %800 = vsyncpa [#allocation3], 1 }

</bundles_post_ra>
